<compile_context>
chip_gen: v6e
topology: v6e:2x2x1
jax: 0.10.0
libtpu: 0.0.40
codegen_flags: <defaults>
</compile_context>

<pallas_src>
import functools

import jax
import jax.numpy as jnp
from jax.experimental import pallas as pl
from jax.experimental.pallas import tpu as pltpu


def _round_up(x, m):
    return (x + m - 1) // m * m


def tiered_kernel(
    x_ref,      # [TILE_M, D_pad]  bf16   token tile
    p_ref,      # [B, TILE_M]      bf16   pooling matrix tile (1.0 where token in batch b)
    we_ref,     # [D_pad, H_pad]   bf16   trunk weight
    be_ref,     # [1, H_pad]       f32    trunk bias
    wt_ref,     # [H_pad, C_tok_pad] bf16 fused pre|eff head weight
    bt_ref,     # [1, C_tok_pad]   f32    fused pre|eff head bias
    ws_ref,     # [H_pad, C_sc_pad] bf16  fused conf|story head weight
    bs_ref,     # [1, C_sc_pad]    f32    fused conf|story head bias
    tok_ref,    # [TILE_M, C_tok_pad] f32 per-token logits (pre|eff, padded)
    sc_ref,     # [B, C_sc_pad]    f32    per-story logits (conf|story, padded)
    pooled_acc, # VMEM scratch [B, H_pad] f32  running sum over tokens
    *,
    inv_s,      # python float 1/S (hoisted)
):
    step = pl.program_id(0)

    @pl.when(step == 0)
    def _():
        pooled_acc[...] = jnp.zeros_like(pooled_acc)

    # ---- shared trunk: h = ReLU(x @ W_e + b_e) ------------------------------
    h = jnp.dot(x_ref[...], we_ref[...], preferred_element_type=jnp.float32)
    h = jnp.maximum(h + be_ref[...], 0.0)              # [TILE_M, H_pad] f32
    h_bf = h.astype(jnp.bfloat16)

    # ---- fused per-token heads (pre | eff), lane-dense 128-wide output ------
    tok = jnp.dot(h_bf, wt_ref[...], preferred_element_type=jnp.float32) + bt_ref[...]
    tok_ref[...] = tok.astype(tok_ref.dtype)

    # ---- pooled accumulation on the MXU: P @ h ------------------------------
    pooled_acc[...] += jnp.dot(p_ref[...], h_bf, preferred_element_type=jnp.float32)

    # ---- finalize: mean-pool scale + fused per-story heads (conf | story) ---
    @pl.when(step == pl.num_programs(0) - 1)
    def _():
        pooled_bf = (pooled_acc[...] * inv_s).astype(jnp.bfloat16)   # [B, H_pad]
        sc = jnp.dot(pooled_bf, ws_ref[...], preferred_element_type=jnp.float32) + bs_ref[...]
        sc_ref[...] = sc.astype(sc_ref.dtype)


@functools.partial(jax.jit, static_argnames=("tile_m",))
def tiered_model_forward(x, params, *, tile_m=512):
    """TieredModel forward as one pipelined Pallas call.

    Returns (story_pred, conflict_pred, precondition_pred, effect_pred),
    matching the PyTorch forward's return order.
    """
    B, S, D_in = x.shape
    H = params["W_e"].shape[1]
    C_pre = params["W_pre"].shape[1]
    C_eff = params["W_eff"].shape[1]
    C_conf = params["W_conf"].shape[1]
    C_story = params["W_story"].shape[1]

    M = B * S
    D_pad = _round_up(D_in, 128)
    H_pad = _round_up(H, 128)
    C_tok_pad = _round_up(C_pre + C_eff, 128)
    C_sc_pad = _round_up(C_conf + C_story, 128)

    # Token tile: modest size keeps the double-buffered working set far below
    # v7x's 64 MiB VMEM while still filling MXU rows.
    TILE_M = min(tile_m, _round_up(M, 128))
    M_pad = _round_up(M, TILE_M)
    grid_m = M_pad // TILE_M

    bf16, f32 = jnp.bfloat16, jnp.float32

    # ---- flatten + pad inputs / weights (lane-dense, bf16 matmul operands) --
    x_pad = jnp.zeros((M_pad, D_pad), bf16).at[:M, :D_in].set(
        x.reshape(M, D_in).astype(bf16))

    tok_ids = jnp.arange(M_pad)
    pool = ((tok_ids[None, :] // S == jnp.arange(B)[:, None])
            & (tok_ids[None, :] < M)).astype(bf16)          # [B, M_pad], 1.0/0.0

    W_e = jnp.zeros((D_pad, H_pad), bf16).at[:D_in, :H].set(params["W_e"].astype(bf16))
    b_e = jnp.zeros((1, H_pad), f32).at[:, :H].set(params["b_e"].astype(f32))

    W_tok = (jnp.zeros((H_pad, C_tok_pad), bf16)
             .at[:H, :C_pre].set(params["W_pre"].astype(bf16))
             .at[:H, C_pre:C_pre + C_eff].set(params["W_eff"].astype(bf16)))
    b_tok = (jnp.zeros((1, C_tok_pad), f32)
             .at[:, :C_pre].set(params["b_pre"].astype(f32))
             .at[:, C_pre:C_pre + C_eff].set(params["b_eff"].astype(f32)))

    W_sc = (jnp.zeros((H_pad, C_sc_pad), bf16)
            .at[:H, :C_conf].set(params["W_conf"].astype(bf16))
            .at[:H, C_conf:C_conf + C_story].set(params["W_story"].astype(bf16)))
    b_sc = (jnp.zeros((1, C_sc_pad), f32)
            .at[:, :C_conf].set(params["b_conf"].astype(f32))
            .at[:, C_conf:C_conf + C_story].set(params["b_story"].astype(f32)))

    kernel = functools.partial(tiered_kernel, inv_s=1.0 / S)

    tok_logits, sc_logits = pl.pallas_call(
        kernel,
        out_shape=(
            jax.ShapeDtypeStruct((M_pad, C_tok_pad), f32),  # fused pre|eff logits
            jax.ShapeDtypeStruct((B, C_sc_pad), f32),       # fused conf|story logits
        ),
        grid_spec=pltpu.PrefetchScalarGridSpec(
            num_scalar_prefetch=0,
            grid=(grid_m,),
            in_specs=[
                pl.BlockSpec((TILE_M, D_pad), lambda i: (i, 0)),     # x tile
                pl.BlockSpec((B, TILE_M), lambda i: (0, i)),         # pooling tile
                pl.BlockSpec((D_pad, H_pad), lambda i: (0, 0)),      # W_e
                pl.BlockSpec((1, H_pad), lambda i: (0, 0)),          # b_e
                pl.BlockSpec((H_pad, C_tok_pad), lambda i: (0, 0)),  # W_tok
                pl.BlockSpec((1, C_tok_pad), lambda i: (0, 0)),      # b_tok
                pl.BlockSpec((H_pad, C_sc_pad), lambda i: (0, 0)),   # W_sc
                pl.BlockSpec((1, C_sc_pad), lambda i: (0, 0)),       # b_sc
            ],
            out_specs=[
                pl.BlockSpec((TILE_M, C_tok_pad), lambda i: (i, 0)),
                pl.BlockSpec((B, C_sc_pad), lambda i: (0, 0)),
            ],
            scratch_shapes=[pltpu.VMEM((B, H_pad), jnp.float32)],
        ),
        compiler_params=pltpu.CompilerParams(
            # Token axis carries the pooled accumulator + resident story/conf
            # output block, so it must be "arbitrary".
            dimension_semantics=("arbitrary",),
        ),
    )(x_pad, pool, W_e, b_e, W_tok, b_tok, W_sc, b_sc)

    # ---- split the fused / padded logits back into the four heads -----------
    tok_logits = tok_logits[:M].reshape(B, S, C_tok_pad)
    precondition_pred = tok_logits[..., :C_pre]
    effect_pred = tok_logits[..., C_pre:C_pre + C_eff]
    conflict_pred = sc_logits[:, :C_conf]
    story_pred = sc_logits[:, C_conf:C_conf + C_story]
    return story_pred, conflict_pred, precondition_pred, effect_pred


def init_params(key, d_in, hidden, c_pre, c_eff, c_conf, c_story):
    """Deterministic synthetic parameters (no checkpoint loading)."""
    ks = jax.random.split(key, 10)

    def lin(kw, kb, fan_in, fan_out):
        w = jax.random.normal(kw, (fan_in, fan_out), jnp.float32) * (fan_in ** -0.5)
        b = jax.random.normal(kb, (1, fan_out), jnp.float32) * 0.01
        return w, b

    W_e, b_e = lin(ks[0], ks[1], d_in, hidden)
    W_pre, b_pre = lin(ks[2], ks[3], hidden, c_pre)
    W_eff, b_eff = lin(ks[4], ks[5], hidden, c_eff)
    W_conf, b_conf = lin(ks[6], ks[7], hidden, c_conf)
    W_story, b_story = lin(ks[8], ks[9], hidden, c_story)

    return dict(
        W_e=W_e, b_e=b_e,
        W_pre=W_pre, b_pre=b_pre,
        W_eff=W_eff, b_eff=b_eff,
        W_conf=W_conf, b_conf=b_conf,
        W_story=W_story, b_story=b_story,
    )


def _reference(x, params):
    """Pure-JAX reference mirroring the kernel's bf16-input / f32-accumulate math."""
    bf = lambda a: a.astype(jnp.bfloat16).astype(jnp.float32)
    h = jnp.maximum(
        jnp.einsum("bsd,dh->bsh", bf(x), bf(params["W_e"])) + params["b_e"], 0.0)
    hb = bf(h)
    pre = jnp.einsum("bsh,hc->bsc", hb, bf(params["W_pre"])) + params["b_pre"]
    eff = jnp.einsum("bsh,hc->bsc", hb, bf(params["W_eff"])) + params["b_eff"]
    pooled = bf(jnp.mean(hb, axis=1))
    conf = pooled @ bf(params["W_conf"]) + params["b_conf"]
    story = pooled @ bf(params["W_story"]) + params["b_story"]
    return story, conf, pre, eff


if __name__ == "__main__":
    # Small shapes consistent with the tiered forward pass.
    B, S, D_IN, HIDDEN = 2, 8, 16, 32
    C_PRE, C_EFF, C_CONF, C_STORY = 4, 4, 2, 2

    key = jax.random.PRNGKey(0)
    k_x, k_p = jax.random.split(key)

    x = jax.random.normal(k_x, (B, S, D_IN), jnp.float32)  # layout: [B, S, D_in]
    params = init_params(k_p, D_IN, HIDDEN, C_PRE, C_EFF, C_CONF, C_STORY)

    story_pred, conflict_pred, precondition_pred, effect_pred = jax.block_until_ready(
        tiered_model_forward(x, params)
    )

    story_ref, conf_ref, pre_ref, eff_ref = _reference(x, params)
    assert jnp.allclose(story_pred, story_ref, atol=1e-2, rtol=1e-2)
    assert jnp.allclose(conflict_pred, conf_ref, atol=1e-2, rtol=1e-2)
    assert jnp.allclose(precondition_pred, pre_ref, atol=1e-2, rtol=1e-2)
    assert jnp.allclose(effect_pred, eff_ref, atol=1e-2, rtol=1e-2)
    assert story_pred.shape == (B, C_STORY)
    assert conflict_pred.shape == (B, C_CONF)
    assert precondition_pred.shape == (B, S, C_PRE)
    assert effect_pred.shape == (B, S, C_EFF)

    # TODO(synk): training_step / shared_step / calculate_metrics in the PyTorch
    # skeleton have no defined math (losses are literal zeros), so only the
    # forward pass is implemented as a kernel.

    print("KERNEL_OK")
</pallas_src>

<mosaic_0001>
module attributes {stable_mosaic.version = 11 : i64} {
  func.func @tiered_kernel(%arg0: i32, %arg1: memref<128x128xbf16, #tpu.memory_space<vmem>>, %arg2: memref<2x128xbf16, #tpu.memory_space<vmem>>, %arg3: memref<128x128xbf16, #tpu.memory_space<vmem>>, %arg4: memref<1x128xf32, #tpu.memory_space<vmem>>, %arg5: memref<128x128xbf16, #tpu.memory_space<vmem>>, %arg6: memref<1x128xf32, #tpu.memory_space<vmem>>, %arg7: memref<128x128xbf16, #tpu.memory_space<vmem>>, %arg8: memref<1x128xf32, #tpu.memory_space<vmem>>, %arg9: memref<128x128xf32, #tpu.memory_space<vmem>>, %arg10: memref<2x128xf32, #tpu.memory_space<vmem>>, %arg11: memref<2x128xf32, #tpu.memory_space<vmem>>) attributes {dimension_semantics = [#tpu.dimension_semantics<arbitrary>], iteration_bounds = array<i64: 1>, scalar_prefetch = 0 : i64, scratch_operands = 1 : i64, tpu.core_type = #tpu.core_type<tc>, window_params = [{transform_indices = @transform_0, window_bounds = array<i64: 128, 128>}, {transform_indices = @transform_1, window_bounds = array<i64: 2, 128>}, {pipeline_mode = #tpu.pipeline_mode<synchronous>, transform_indices = @transform_2, window_bounds = array<i64: 128, 128>}, {pipeline_mode = #tpu.pipeline_mode<synchronous>, transform_indices = @transform_3, window_bounds = array<i64: 1, 128>}, {pipeline_mode = #tpu.pipeline_mode<synchronous>, transform_indices = @transform_4, window_bounds = array<i64: 128, 128>}, {pipeline_mode = #tpu.pipeline_mode<synchronous>, transform_indices = @transform_5, window_bounds = array<i64: 1, 128>}, {pipeline_mode = #tpu.pipeline_mode<synchronous>, transform_indices = @transform_6, window_bounds = array<i64: 128, 128>}, {pipeline_mode = #tpu.pipeline_mode<synchronous>, transform_indices = @transform_7, window_bounds = array<i64: 1, 128>}, {transform_indices = @transform_8, window_bounds = array<i64: 128, 128>}, {pipeline_mode = #tpu.pipeline_mode<synchronous>, transform_indices = @transform_9, window_bounds = array<i64: 2, 128>}]} {
    %c0_i32 = arith.constant 0 : i32
    %0 = arith.cmpi eq, %arg0, %c0_i32 : i32
    %1 = arith.extui %0 : i1 to i32
    %c0_i32_0 = arith.constant 0 : i32
    %2 = arith.cmpi ne, %1, %c0_i32_0 : i32
    scf.if %2 {
      %cst_23 = arith.constant 0.000000e+00 : f32
      %26 = vector.broadcast %cst_23 : f32 to vector<2x128xf32>
      %c0_24 = arith.constant 0 : index
      %c0_25 = arith.constant 0 : index
      %27 = vector.load %arg11[%c0_24, %c0_25] : memref<2x128xf32, #tpu.memory_space<vmem>>, vector<2x128xf32>
      tpu.vector_store %arg11[%c0_24, %c0_25], %26 {strides = array<i32>} : memref<2x128xf32, #tpu.memory_space<vmem>>, vector<2x128xf32>,
    } else {
    }
    %c0 = arith.constant 0 : index
    %c0_1 = arith.constant 0 : index
    %3 = vector.load %arg1[%c0, %c0_1] : memref<128x128xbf16, #tpu.memory_space<vmem>>, vector<128x128xbf16>
    %c0_2 = arith.constant 0 : index
    %c0_3 = arith.constant 0 : index
    %4 = vector.load %arg3[%c0_2, %c0_3] : memref<128x128xbf16, #tpu.memory_space<vmem>>, vector<128x128xbf16>
    %cst = arith.constant dense<0.000000e+00> : vector<128x128xf32>
    %5 = tpu.matmul %3, %4, %cst {dimension_numbers = #tpu.dot_dimension_numbers<[1], [0], [0], [1], [0, 0, 1, 1], [], []>} : vector<128x128xbf16>, vector<128x128xbf16>, vector<128x128xf32> -> vector<128x128xf32>
    %c0_4 = arith.constant 0 : index
    %c0_5 = arith.constant 0 : index
    %6 = vector.load %arg4[%c0_4, %c0_5] : memref<1x128xf32, #tpu.memory_space<vmem>>, vector<1x128xf32>
    %7 = vector.broadcast %6 : vector<1x128xf32> to vector<128x128xf32>
    %8 = arith.addf %5, %7 : vector<128x128xf32>
    %cst_6 = arith.constant 0.000000e+00 : f32
    %9 = vector.broadcast %cst_6 : f32 to vector<128x128xf32>
    %10 = arith.maximumf %8, %9 : vector<128x128xf32>
    %11 = arith.truncf %10 : vector<128x128xf32> to vector<128x128xbf16>
    %c0_7 = arith.constant 0 : index
    %c0_8 = arith.constant 0 : index
    %12 = vector.load %arg5[%c0_7, %c0_8] : memref<128x128xbf16, #tpu.memory_space<vmem>>, vector<128x128xbf16>
    %cst_9 = arith.constant dense<0.000000e+00> : vector<128x128xf32>
    %13 = tpu.matmul %11, %12, %cst_9 {dimension_numbers = #tpu.dot_dimension_numbers<[1], [0], [0], [1], [0, 0, 1, 1], [], []>} : vector<128x128xbf16>, vector<128x128xbf16>, vector<128x128xf32> -> vector<128x128xf32>
    %c0_10 = arith.constant 0 : index
    %c0_11 = arith.constant 0 : index
    %14 = vector.load %arg6[%c0_10, %c0_11] : memref<1x128xf32, #tpu.memory_space<vmem>>, vector<1x128xf32>
    %15 = vector.broadcast %14 : vector<1x128xf32> to vector<128x128xf32>
    %16 = arith.addf %13, %15 : vector<128x128xf32>
    %c0_12 = arith.constant 0 : index
    %c0_13 = arith.constant 0 : index
    %17 = vector.load %arg9[%c0_12, %c0_13] : memref<128x128xf32, #tpu.memory_space<vmem>>, vector<128x128xf32>
    tpu.vector_store %arg9[%c0_12, %c0_13], %16 {strides = array<i32>} : memref<128x128xf32, #tpu.memory_space<vmem>>, vector<128x128xf32>,
    %c0_14 = arith.constant 0 : index
    %c0_15 = arith.constant 0 : index
    %18 = vector.load %arg11[%c0_14, %c0_15] : memref<2x128xf32, #tpu.memory_space<vmem>>, vector<2x128xf32>
    %c0_16 = arith.constant 0 : index
    %c0_17 = arith.constant 0 : index
    %19 = vector.load %arg2[%c0_16, %c0_17] : memref<2x128xbf16, #tpu.memory_space<vmem>>, vector<2x128xbf16>
    %cst_18 = arith.constant dense<0.000000e+00> : vector<2x128xf32>
    %20 = tpu.matmul %19, %11, %cst_18 {dimension_numbers = #tpu.dot_dimension_numbers<[1], [0], [0], [1], [0, 0, 1, 1], [], []>} : vector<2x128xbf16>, vector<128x128xbf16>, vector<2x128xf32> -> vector<2x128xf32>
    %21 = arith.addf %18, %20 : vector<2x128xf32>
    %c0_19 = arith.constant 0 : index
    %c0_20 = arith.constant 0 : index
    %22 = vector.load %arg11[%c0_19, %c0_20] : memref<2x128xf32, #tpu.memory_space<vmem>>, vector<2x128xf32>
    tpu.vector_store %arg11[%c0_19, %c0_20], %21 {strides = array<i32>} : memref<2x128xf32, #tpu.memory_space<vmem>>, vector<2x128xf32>,
    %c0_i32_21 = arith.constant 0 : i32
    %23 = arith.cmpi eq, %arg0, %c0_i32_21 : i32
    %24 = arith.extui %23 : i1 to i32
    %c0_i32_22 = arith.constant 0 : i32
    %25 = arith.cmpi ne, %24, %c0_i32_22 : i32
    scf.if %25 {
      %c0_23 = arith.constant 0 : index
      %c0_24 = arith.constant 0 : index
      %26 = vector.load %arg11[%c0_23, %c0_24] : memref<2x128xf32, #tpu.memory_space<vmem>>, vector<2x128xf32>
      %cst_25 = arith.constant 1.250000e-01 : f32
      %27 = vector.broadcast %cst_25 : f32 to vector<2x128xf32>
      %28 = arith.mulf %26, %27 : vector<2x128xf32>
      %29 = arith.truncf %28 : vector<2x128xf32> to vector<2x128xbf16>
      %c0_26 = arith.constant 0 : index
      %c0_27 = arith.constant 0 : index
      %30 = vector.load %arg7[%c0_26, %c0_27] : memref<128x128xbf16, #tpu.memory_space<vmem>>, vector<128x128xbf16>
      %cst_28 = arith.constant dense<0.000000e+00> : vector<2x128xf32>
      %31 = tpu.matmul %29, %30, %cst_28 {dimension_numbers = #tpu.dot_dimension_numbers<[1], [0], [0], [1], [0, 0, 1, 1], [], []>} : vector<2x128xbf16>, vector<128x128xbf16>, vector<2x128xf32> -> vector<2x128xf32>
      %c0_29 = arith.constant 0 : index
      %c0_30 = arith.constant 0 : index
      %32 = vector.load %arg8[%c0_29, %c0_30] : memref<1x128xf32, #tpu.memory_space<vmem>>, vector<1x128xf32>
      %33 = vector.broadcast %32 : vector<1x128xf32> to vector<2x128xf32>
      %34 = arith.addf %31, %33 : vector<2x128xf32>
      %c0_31 = arith.constant 0 : index
      %c0_32 = arith.constant 0 : index
      %35 = vector.load %arg10[%c0_31, %c0_32] : memref<2x128xf32, #tpu.memory_space<vmem>>, vector<2x128xf32>
      tpu.vector_store %arg10[%c0_31, %c0_32], %34 {strides = array<i32>} : memref<2x128xf32, #tpu.memory_space<vmem>>, vector<2x128xf32>,
    } else {
    }
    return
  }
  func.func @transform_0(%arg0: i32) -> (i32, i32) {
    %c0_i32 = arith.constant 0 : i32
    %c0_i32_0 = arith.constant 0 : i32
    return %arg0, %c0_i32 : i32, i32
  }
  func.func @transform_1(%arg0: i32) -> (i32, i32) {
    %c0_i32 = arith.constant 0 : i32
    %c0_i32_0 = arith.constant 0 : i32
    return %c0_i32, %arg0 : i32, i32
  }
  func.func @transform_2(%arg0: i32) -> (i32, i32) {
    %c0_i32 = arith.constant 0 : i32
    %c0_i32_0 = arith.constant 0 : i32
    %c0_i32_1 = arith.constant 0 : i32
    return %c0_i32, %c0_i32_0 : i32, i32
  }
  func.func @transform_3(%arg0: i32) -> (i32, i32) {
    %c0_i32 = arith.constant 0 : i32
    %c0_i32_0 = arith.constant 0 : i32
    %c0_i32_1 = arith.constant 0 : i32
    return %c0_i32, %c0_i32_0 : i32, i32
  }
  func.func @transform_4(%arg0: i32) -> (i32, i32) {
    %c0_i32 = arith.constant 0 : i32
    %c0_i32_0 = arith.constant 0 : i32
    %c0_i32_1 = arith.constant 0 : i32
    return %c0_i32, %c0_i32_0 : i32, i32
  }
  func.func @transform_5(%arg0: i32) -> (i32, i32) {
    %c0_i32 = arith.constant 0 : i32
    %c0_i32_0 = arith.constant 0 : i32
    %c0_i32_1 = arith.constant 0 : i32
    return %c0_i32, %c0_i32_0 : i32, i32
  }
  func.func @transform_6(%arg0: i32) -> (i32, i32) {
    %c0_i32 = arith.constant 0 : i32
    %c0_i32_0 = arith.constant 0 : i32
    %c0_i32_1 = arith.constant 0 : i32
    return %c0_i32, %c0_i32_0 : i32, i32
  }
  func.func @transform_7(%arg0: i32) -> (i32, i32) {
    %c0_i32 = arith.constant 0 : i32
    %c0_i32_0 = arith.constant 0 : i32
    %c0_i32_1 = arith.constant 0 : i32
    return %c0_i32, %c0_i32_0 : i32, i32
  }
  func.func @transform_8(%arg0: i32) -> (i32, i32) {
    %c0_i32 = arith.constant 0 : i32
    %c0_i32_0 = arith.constant 0 : i32
    return %arg0, %c0_i32 : i32, i32
  }
  func.func @transform_9(%arg0: i32) -> (i32, i32) {
    %c0_i32 = arith.constant 0 : i32
    %c0_i32_0 = arith.constant 0 : i32
    %c0_i32_1 = arith.constant 0 : i32
    return %c0_i32, %c0_i32_0 : i32, i32
  }
}

</mosaic_0001>

<bundles_post_ra>
// kernel: tiered_model_forward.1
= control target key start
LH: loop header
LB: loop body
LE: loop exit
PB: predicated region body
PF: predicated region fallthrough
CT: control target
= control target key end

     0   :  { %v870_v24 = vmov 0.0   ;;  %vm871_vm0 = vmmov 0   ;;  %s1106_s2 = inlined_call_operand.vmem [shape: bf16[128,128], index: 2, kind: input, shape index: {}]   ;;  %s1107_s0 = inlined_call_operand.vmem [shape: bf16[128,128], index: 0, kind: input, shape index: {}]   ;;  %s1108_s4 = inlined_call_operand.vmem [shape: bf16[128,128], index: 4, kind: input, shape index: {}]   ;;  %s1109_s3 = inlined_call_operand.vmem [shape: f32[1,128], index: 3, kind: input, shape index: {}]   ;;  %s1110_s1 = inlined_call_operand.vmem [shape: bf16[2,128], index: 1, kind: input, shape index: {}]   ;;  %s1111_s6 = inlined_call_operand.vmem [shape: bf16[128,128], index: 6, kind: input, shape index: {}]   ;;  %s1112_s5 = inlined_call_operand.vmem [shape: f32[1,128], index: 5, kind: input, shape index: {}]   ;;  %s1113_s8 = inlined_call_operand.vmem [shape: f32[128,128], index: 8, kind: output, shape index: {0}]   ;;  %s1114_s7 = inlined_call_operand.vmem [shape: f32[1,128], index: 7, kind: input, shape index: {}]   ;;  %s1115_s9 = inlined_call_operand.vmem [shape: f32[2,128], index: 9, kind: output, shape index: {1}]  }
   0x1   :  { %v838_v0 = vld [vmem:[%s1106_s2 + $0x38] sm:$0xff]   ;;  %v839_v1 = vld [vmem:[%s1106_s2 + $0x30] sm:$0xff]   ;;  %v840_v2 = vld [vmem:[%s1106_s2 + $0x28] sm:$0xff]   ;;  %36 = vst [vmem:[#allocation2] sm:$0x3] %v870_v24 }
   0x2   :  { %732 = vmatprep.subr.bf16.mxu0 %v838_v0  ;;  %v841_v3 = vld [vmem:[%s1106_s2 + $0x20] sm:$0xff]   ;;  %v842_v5 = vld [vmem:[%s1106_s2 + $0x18] sm:$0xff]   ;;  %v843_v6 = vld [vmem:[%s1106_s2 + $0x10] sm:$0xff]  }
   0x3   :  { %733 = vmatpush3.bf16.msra.mxu0 %v838_v0  ;;  %v846_v4 = vld [vmem:[%s1107_s0] sm:$0xff]   ;;  %v854_v7 = vld [vmem:[%s1108_s4 + $0x38] sm:$0xff]   ;;  %v855_v8 = vld [vmem:[%s1108_s4 + $0x30] sm:$0xff]  }
   0x4   :  { %734 = vmatprep.subr.bf16.mxu0 %v839_v1  ;;  %748 = vmatprep.mubr.bf16.mxu0 %v846_v4  ;;  %v844_v9 = vld [vmem:[%s1106_s2 + $0x8] sm:$0xff]   ;;  %v845_v11 = vld [vmem:[%s1106_s2] sm:$0xff]   ;;  %v858_v13 = vld [vmem:[%s1108_s4 + $0x18] sm:$0xff]  }
   0x5   :  { %764 = vmatprep.subr.bf16.mxu1 %v854_v7  ;;  %v856_v10 = vld [vmem:[%s1108_s4 + $0x28] sm:$0xff]   ;;  %v857_v12 = vld [vmem:[%s1108_s4 + $0x20] sm:$0xff]   ;;  %v848_v15 = vld [vmem:[%s1107_s0 + $0x10] sm:$0xff]  }
   0x6   :  { %765 = vmatpush3.bf16.msra.mxu1 %v854_v7  ;;  %v847_v14 = vld [vmem:[%s1107_s0 + $0x8] sm:$0xff]   ;;  %v849_v16 = vld [vmem:[%s1107_s0 + $0x18] sm:$0xff]   ;;  %v850_v17 = vld [vmem:[%s1107_s0 + $0x20] sm:$0xff]  }
   0x7   :  { %735 = vmatpush3.bf16.msra.mxu0 %v839_v1  ;;  %766 = vmatprep.subr.bf16.mxu1 %v855_v8  ;;  %v851_v18 = vld [vmem:[%s1107_s0 + $0x28] sm:$0xff]   ;;  %v852_v19 = vld [vmem:[%s1107_s0 + $0x30] sm:$0xff]   ;;  %v853_v20 = vld [vmem:[%s1107_s0 + $0x38] sm:$0xff]  }
   0x8   :  { %736 = vmatprep.subr.bf16.mxu0 %v840_v2  ;;  %v859_v21 = vld [vmem:[%s1108_s4 + $0x10] sm:$0xff]   ;;  %v860_v22 = vld [vmem:[%s1108_s4 + $0x8] sm:$0xff]   ;;  %v861_v23 = vld [vmem:[%s1108_s4] sm:$0xff]  }
   0x9   :  { %v647_v27 = vld [vmem:[%s1109_s3] ss:$0 sm:$0xff] }
   0xa   :  { %767 = vmatpush3.bf16.msra.mxu1 %v855_v8 }
   0xb   :  { %737 = vmatpush3.bf16.msra.mxu0 %v840_v2  ;;  %768 = vmatprep.subr.bf16.mxu1 %v856_v10 }
   0xc   :  { %738 = vmatprep.subr.bf16.mxu0 %v841_v3 }
   0xe   :  { %769 = vmatpush3.bf16.msra.mxu1 %v856_v10 }
   0xf   :  { %739 = vmatpush3.bf16.msra.mxu0 %v841_v3  ;;  %770 = vmatprep.subr.bf16.mxu1 %v857_v12 }
  0x10   :  { %740 = vmatprep.subr.bf16.mxu0 %v842_v5 }
  0x12   :  { %771 = vmatpush3.bf16.msra.mxu1 %v857_v12 }
  0x13   :  { %741 = vmatpush3.bf16.msra.mxu0 %v842_v5  ;;  %772 = vmatprep.subr.bf16.mxu1 %v858_v13 }
  0x14   :  { %742 = vmatprep.subr.bf16.mxu0 %v843_v6 }
  0x16   :  { %773 = vmatpush3.bf16.msra.mxu1 %v858_v13 }
  0x17   :  { %743 = vmatpush3.bf16.msra.mxu0 %v843_v6  ;;  %774 = vmatprep.subr.bf16.mxu1 %v859_v21 }
  0x18   :  { %744 = vmatprep.subr.bf16.mxu0 %v844_v9 }
  0x1a   :  { %775 = vmatpush3.bf16.msra.mxu1 %v859_v21  ;;  %v864_v21 = vld [vmem:[%s1111_s6 + $0x28] sm:$0xff]  }
  0x1b   :  { %745 = vmatpush3.bf16.msra.mxu0 %v844_v9  ;;  %776 = vmatprep.subr.bf16.mxu1 %v860_v22 }
  0x1c   :  { %746 = vmatprep.subr.bf16.mxu0 %v845_v11 }
  0x1e   :  { %777 = vmatpush3.bf16.msra.mxu1 %v860_v22  ;;  %v865_v22 = vld [vmem:[%s1111_s6 + $0x20] sm:$0xff]  }
  0x1f   :  { %747 = vmatpush3.bf16.msra.mxu0 %v845_v11  ;;  %778 = vmatprep.subr.bf16.mxu1 %v861_v23 }
  0x20   :  { %796 = vmatprep.subr.bf16.mxu0 %v870_v24 }
  0x22   :  { %749 = vmatmul.mubr.bf16.vlgmr.msra.gmra.mxu0 %v847_v14  ;;  %779 = vmatpush3.bf16.msra.mxu1 %v861_v23  ;;  %v866_v23 = vld [vmem:[%s1111_s6 + $0x18] sm:$0xff]  }
  0x23   :  { %752 = vmatprep.mubr.bf16.mxu0 %v848_v15  ;;  %816 = vmatprep.subr.bf16.mxu1 %v870_v24 }
  0x2a   :  { %753 = vmatmul.mubr.bf16.gmra.mxu0 %v849_v16 }
  0x2b   :  { %756 = vmatprep.mubr.bf16.mxu0 %v850_v17 }
  0x32   :  { %757 = vmatmul.mubr.bf16.gmra.mxu0 %v851_v18  ;;  %v478_v18 = vld [vmem:[%s1110_s1] sm:$0x1] }
  0x33   :  { %760 = vmatprep.mubr.bf16.mxu0 %v852_v19  ;;  %v862_v19 = vld [vmem:[%s1111_s6 + $0x38] sm:$0xff]  }
  0x3a   :  { %761 = vmatmul.mubr.bf16.gmra.mxu0 %v853_v20  ;;  %v863_v20 = vld [vmem:[%s1111_s6 + $0x30] sm:$0xff]  }
  0x3b   :  { %812 = vmatprep.mubr.msk.bf16.mxu0 %vm871_vm0, %v870_v24 }
  0xe2   :  { %v750_v25 = vpop.f32.mrf.mxu0 }
  0xe3   :  { %v215_v31 = vadd.f32 %v750_v25, %v647_v27  ;;  %v867_v25 = vld [vmem:[%s1111_s6 + $0x10] sm:$0xff]  }
  0xe4   :  { %v206_v26 = vpop.f32.mrf.mxu0 }
  0xe5   :  { %v207_v29 = vadd.f32 %v647_v27, %v206_v26  ;;  %v271_v38 = vmax.f32 %v215_v31, 0.0  ;;  %v868_v26 = vld [vmem:[%s1111_s6 + $0x8] sm:$0xff]  }
  0xe6   :  { %v751_v28 = vpop.f32.mrf.mxu0 }
  0xe7   :  { %v218_v30 = vadd.f32 %v751_v28, %v647_v27  ;;  %v269_v36 = vmax.f32 %v207_v29, 0.0  ;;  %v664_v28 = vld [vmem:[%s1112_s5] ss:$0 sm:$0xff] }
  0xe8   :  { %v209_v32 = vpop.f32.mrf.mxu0 }
  0xe9   :  { %v210_v33 = vadd.f32 %v647_v27, %v209_v32  ;;  %v272_v34 = vmax.f32 %v218_v30, 0.0 }
  0xea   :  { %v754_v35 = vpop.f32.mrf.mxu0 }
  0xeb   :  { %v270_v37 = vmax.f32 %v210_v33, 0.0  ;;  %v286_v41 = vpack.c.bf16 %v272_v34, %v271_v38  ;;  %v231_v45 = vadd.f32 %v754_v35, %v647_v27 }
  0xec   :  { %v222_v39 = vpop.f32.mrf.mxu0 }
  0xed   :  { %v1002_v40 = vpack.c.bf16 %v270_v37, %v269_v36  ;;  %v223_v43 = vadd.f32 %v647_v27, %v222_v39  ;;  %v275_v52 = vmax.f32 %v231_v45, 0.0 }
  0xee   :  { %v755_v42 = vpop.f32.mrf.mxu0 }
  0xef   :  { %v234_v44 = vadd.f32 %v755_v42, %v647_v27  ;;  %780 = vmatprep.mubr.bf16.mxu1 %v1002_v40  ;;  %v273_v50 = vmax.f32 %v223_v43, 0.0 }
  0xf0   :  { %v225_v46 = vpop.f32.mrf.mxu0  ;;  %781 = vmatmul.mubr.bf16.vlgmr.msra.gmra.mxu1 %v286_v41 }
  0xf1   :  { %v226_v47 = vadd.f32 %v647_v27, %v225_v46  ;;  %v276_v48 = vmax.f32 %v234_v44, 0.0  ;;  %817 = vmatpush3.bf16.msra.mxu1 %v862_v19 }
  0xf2   :  { %v758_v49 = vpop.f32.mrf.mxu0  ;;  %818 = vmatprep.subr.bf16.mxu1 %v870_v24 }
  0xf3   :  { %v274_v51 = vmax.f32 %v226_v47, 0.0  ;;  %v288_v55 = vpack.c.bf16 %v276_v48, %v275_v52  ;;  %v247_v59 = vadd.f32 %v758_v49, %v647_v27 }
  0xf4   :  { %v238_v53 = vpop.f32.mrf.mxu0 }
  0xf5   :  { %v287_v54 = vpack.c.bf16 %v274_v51, %v273_v50  ;;  %v239_v57 = vadd.f32 %v647_v27, %v238_v53  ;;  %v279_v2 = vmax.f32 %v247_v59, 0.0  ;;  %819 = vmatpush3.bf16.msra.mxu1 %v863_v20 }
  0xf6   :  { %v759_v56 = vpop.f32.mrf.mxu0  ;;  %820 = vmatprep.subr.bf16.mxu1 %v870_v24 }
  0xf7   :  { %v250_v58 = vadd.f32 %v759_v56, %v647_v27  ;;  %784 = vmatprep.mubr.bf16.mxu1 %v287_v54  ;;  %v277_v0 = vmax.f32 %v239_v57, 0.0 }
  0xf8   :  { %v241_v60 = vpop.f32.mrf.mxu0  ;;  %785 = vmatmul.mubr.bf16.gmra.mxu1 %v288_v55 }
  0xf9   :  { %v242_v61 = vadd.f32 %v647_v27, %v241_v60  ;;  %v280_v62 = vmax.f32 %v250_v58, 0.0  ;;  %821 = vmatpush3.bf16.msra.mxu1 %v864_v21  ;;  %v477_v60 = vld [vmem:[#allocation2] sm:$0x3] }
  0xfa   :  { %v762_v63 = vpop.f32.mrf.mxu0  ;;  %822 = vmatprep.subr.bf16.mxu1 %v870_v24 }
  0xfb   :  { %v278_v1 = vmax.f32 %v242_v61, 0.0  ;;  %v263_v5 = vadd.f32 %v762_v63, %v647_v27  ;;  %v290_v6 = vpack.c.bf16 %v280_v62, %v279_v2 }
  0xfc   :  { %v254_v3 = vpop.f32.mrf.mxu0 }
  0xfd   :  { %v289_v4 = vpack.c.bf16 %v278_v1, %v277_v0  ;;  %v255_v8 = vadd.f32 %v647_v27, %v254_v3  ;;  %v283_v11 = vmax.f32 %v263_v5, 0.0  ;;  %823 = vmatpush3.bf16.msra.mxu1 %v865_v22  ;;  %v673_v5 = vld [vmem:[%s1114_s7] ss:$0 sm:$0xff] }
  0xfe   :  { %v763_v7 = vpop.f32.mrf.mxu0  ;;  %824 = vmatprep.subr.bf16.mxu1 %v870_v24 }
  0xff   :  { %v266_v9 = vadd.f32 %v763_v7, %v647_v27  ;;  %788 = vmatprep.mubr.bf16.mxu1 %v289_v4  ;;  %v281_v14 = vmax.f32 %v255_v8, 0.0 }
 0x100   :  { %v257_v10 = vpop.f32.mrf.mxu0  ;;  %789 = vmatmul.mubr.bf16.gmra.mxu1 %v290_v6 }
 0x101   :  { %v284_v12 = vmax.f32 %v266_v9, 0.0  ;;  %v258_v13 = vadd.f32 %v647_v27, %v257_v10  ;;  %825 = vmatpush3.bf16.msra.mxu1 %v866_v23  ;;  %v869_v27 = vld [vmem:[%s1111_s6] sm:$0xff]  }
 0x102   :  { %826 = vmatprep.subr.bf16.mxu1 %v870_v24 }
 0x103   :  { %v292_v15 = vpack.c.bf16 %v284_v12, %v283_v11  ;;  %v282_v16 = vmax.f32 %v258_v13, 0.0 }
 0x105   :  { %v291_v17 = vpack.c.bf16 %v282_v16, %v281_v14  ;;  %797 = vmatpush3.bf16.msra.mxu0 %v292_v15  ;;  %827 = vmatpush3.bf16.msra.mxu1 %v867_v25 }
 0x106   :  { %798 = vmatprep.subr.bf16.mxu0 %v870_v24  ;;  %828 = vmatprep.subr.bf16.mxu1 %v870_v24 }
 0x107   :  { %792 = vmatprep.mubr.bf16.mxu1 %v291_v17 }
 0x108   :  { %793 = vmatmul.mubr.bf16.gmra.mxu1 %v292_v15 }
 0x109   :  { %799 = vmatpush3.bf16.msra.mxu0 %v291_v17  ;;  %832 = vmatprep.mubr.msk.bf16.mxu1 %vm871_vm0, %v870_v24 }
 0x10a   :  { %800 = vmatprep.subr.bf16.mxu0 %v870_v24  ;;  %829 = vmatpush3.bf16.msra.mxu1 %v868_v26 }
 0x10b   :  { %830 = vmatprep.subr.bf16.mxu1 %v870_v24 }
 0x10d   :  { %801 = vmatpush3.bf16.msra.mxu0 %v290_v6 }
 0x10e   :  { %802 = vmatprep.subr.bf16.mxu0 %v870_v24  ;;  %831 = vmatpush3.bf16.msra.mxu1 %v869_v27 }
 0x111   :  { %803 = vmatpush3.bf16.msra.mxu0 %v289_v4 }
 0x112   :  { %804 = vmatprep.subr.bf16.mxu0 %v870_v24 }
 0x115   :  { %805 = vmatpush3.bf16.msra.mxu0 %v288_v55 }
 0x116   :  { %806 = vmatprep.subr.bf16.mxu0 %v870_v24 }
 0x119   :  { %807 = vmatpush3.bf16.msra.mxu0 %v287_v54 }
 0x11a   :  { %808 = vmatprep.subr.bf16.mxu0 %v870_v24 }
 0x11d   :  { %809 = vmatpush3.bf16.msra.mxu0 %v286_v41 }
 0x11e   :  { %810 = vmatprep.subr.bf16.mxu0 %v870_v24 }
 0x121   :  { %811 = vmatpush3.bf16.msra.mxu0 %v1002_v40 }
 0x124   :  { %813 = vmatmul.mubr.bf16.vlgmr.msra.gmra.mxu0 %v478_v18 }
 0x1b0   :  { %v782_v29 = vpop.f32.mrf.mxu1 }
 0x1b1   :  { %v407_v30 = vadd.f32 %v782_v29, %v664_v28 }
 0x1b2   :  { %v398_v31 = vpop.f32.mrf.mxu1 }
 0x1b3   :  { %463 = vst [vmem:[%s1113_s8 + $0x10] sm:$0xff] %v407_v30  ;;  %v399_v32 = vadd.f32 %v664_v28, %v398_v31 }
 0x1b4   :  { %v783_v33 = vpop.f32.mrf.mxu1 }
 0x1b5   :  { %461 = vst [vmem:[%s1113_s8] sm:$0xff] %v399_v32  ;;  %v410_v34 = vadd.f32 %v783_v33, %v664_v28 }
 0x1b6   :  { %v401_v24 = vpop.f32.mrf.mxu1 }
 0x1b7   :  { %464 = vst [vmem:[%s1113_s8 + $0x18] sm:$0xff] %v410_v34  ;;  %v402_v35 = vadd.f32 %v664_v28, %v401_v24 }
 0x1b8   :  { %v786_v36 = vpop.f32.mrf.mxu1 }
 0x1b9   :  { %462 = vst [vmem:[%s1113_s8 + $0x8] sm:$0xff] %v402_v35  ;;  %v423_v37 = vadd.f32 %v786_v36, %v664_v28 }
 0x1ba   :  { %v414_v38 = vpop.f32.mrf.mxu1 }
 0x1bb   :  { %467 = vst [vmem:[%s1113_s8 + $0x30] sm:$0xff] %v423_v37  ;;  %v415_v39 = vadd.f32 %v664_v28, %v414_v38 }
 0x1bc   :  { %v787_v40 = vpop.f32.mrf.mxu1 }
 0x1bd   :  { %465 = vst [vmem:[%s1113_s8 + $0x20] sm:$0xff] %v415_v39  ;;  %v426_v41 = vadd.f32 %v787_v40, %v664_v28 }
 0x1be   :  { %v417_v42 = vpop.f32.mrf.mxu1 }
 0x1bf   :  { %468 = vst [vmem:[%s1113_s8 + $0x38] sm:$0xff] %v426_v41  ;;  %v418_v43 = vadd.f32 %v664_v28, %v417_v42 }
 0x1c0   :  { %v790_v44 = vpop.f32.mrf.mxu1 }
 0x1c1   :  { %466 = vst [vmem:[%s1113_s8 + $0x28] sm:$0xff] %v418_v43  ;;  %v439_v45 = vadd.f32 %v790_v44, %v664_v28 }
 0x1c2   :  { %v430_v46 = vpop.f32.mrf.mxu1 }
 0x1c3   :  { %471 = vst [vmem:[%s1113_s8 + $0x50] sm:$0xff] %v439_v45  ;;  %v431_v47 = vadd.f32 %v664_v28, %v430_v46 }
 0x1c4   :  { %v791_v48 = vpop.f32.mrf.mxu1 }
 0x1c5   :  { %469 = vst [vmem:[%s1113_s8 + $0x40] sm:$0xff] %v431_v47  ;;  %v442_v49 = vadd.f32 %v791_v48, %v664_v28 }
 0x1c6   :  { %v433_v50 = vpop.f32.mrf.mxu1 }
 0x1c7   :  { %472 = vst [vmem:[%s1113_s8 + $0x58] sm:$0xff] %v442_v49  ;;  %v434_v51 = vadd.f32 %v664_v28, %v433_v50 }
 0x1c8   :  { %v794_v52 = vpop.f32.mrf.mxu1 }
 0x1c9   :  { %470 = vst [vmem:[%s1113_s8 + $0x48] sm:$0xff] %v434_v51  ;;  %v455_v53 = vadd.f32 %v794_v52, %v664_v28 }
 0x1ca   :  { %v446_v54 = vpop.f32.mrf.mxu1 }
 0x1cb   :  { %475 = vst [vmem:[%s1113_s8 + $0x70] sm:$0xff] %v455_v53  ;;  %v447_v55 = vadd.f32 %v664_v28, %v446_v54 }
 0x1cc   :  { %v795_v56 = vpop.f32.mrf.mxu1 }
 0x1cd   :  { %473 = vst [vmem:[%s1113_s8 + $0x60] sm:$0xff] %v447_v55  ;;  %v458_v57 = vadd.f32 %v795_v56, %v664_v28 }
 0x1ce   :  { %v449_v58 = vpop.f32.mrf.mxu1 }
 0x1cf   :  { %476 = vst [vmem:[%s1113_s8 + $0x78] sm:$0xff] %v458_v57  ;;  %v450_v59 = vadd.f32 %v664_v28, %v449_v58 }
 0x1d1   :  { %474 = vst [vmem:[%s1113_s8 + $0x68] sm:$0xff] %v450_v59 }
 0x1e4   :  { %v513_v61 = vpop.f32.mrf.mxu0 }
 0x1e5   :  { %v519_v62 = vadd.f32 %v513_v61, %v477_v60 }
 0x1e6   :  { %v814_v63 = vpop.f32.mrf.mxu0 }
 0x1e7   :  { %520 = vst [vmem:[#allocation2] sm:$0x3] %v519_v62 }
 0x1e8   :  { %v516_v0 = vpop.f32.mrf.mxu0 }
 0x1ea   :  { %v815_v1 = vpop.f32.mrf.mxu0 }
 0x1ee   :  { %v524_v2 = vld [vmem:[#allocation2] sm:$0x3] }
 0x1ef   :  { %v525_v3 = vmul.f32 0.125, %v524_v2 }
 0x1f1   :  { %v526_v4 = vpack.c.bf16 %v525_v3, %v525_v3 }
 0x1f3   :  { %833 = vmatmul.mubr.bf16.vlgmr.msra.gmra.mxu1 %v526_v4 }
 0x2b3   :  { %v632_v6 = vpop.f32.mrf.mxu1 }
 0x2b4   :  { %v633_v7 = vadd.f32 %v673_v5, %v632_v6 }
 0x2b5   :  { %v834_v8 = vpop.f32.mrf.mxu1 }
 0x2b6   :  { %638 = vst [vmem:[%s1115_s9] sm:$0x3] %v633_v7 }
 0x2b7   :  { %v635_v9 = vpop.f32.mrf.mxu1 }
 0x2b9   :  { %v835_v10 = vpop.f32.mrf.mxu1 }

</bundles_post_ra>
